<compile_context>
chip_gen: v5e
topology: v5e:2x2
jax: 0.10.0
libtpu: 0.0.40
codegen_flags: <defaults>
</compile_context>

<pallas_src>
import functools

import jax
import jax.numpy as jnp
from jax.experimental import pallas as pl
from jax.experimental.pallas import tpu as pltpu

_LANE = 128
_LANE_CAP = 131072          # max tile_d lanes (f32: 2 ops x 2 bufs x 4 MiB = 16 MiB)


def _sublanes(itemsize):
    # Sub-32-bit dtypes pack along sublanes: f32 -> 8 rows/tile, bf16 -> 16, int8 -> 32.
    return max(8, 32 // max(1, itemsize))


def _round_up(v, m):
    return ((v + m - 1) // m) * m


def _vmem_limit_bytes():
    """Per-generation VMEM limit: ~half of physical per-core VMEM."""
    phys = 64 * 1024 * 1024                      # conservative default (v7x per-TC)
    try:
        info = pltpu.get_tpu_info()
        cap = getattr(info, "vmem_capacity_bytes", None)
        if cap:
            phys = int(cap)
    except Exception:
        pass
    # 32 MiB on v7x (64 MiB physical), 64 MiB on v5e/v6e (128 MiB physical).
    return min(max(phys // 2, 32 * 1024 * 1024), 64 * 1024 * 1024)


def _choose_tiles(n, d, isz_x, isz_t, budget):
    """Pick (tile_n, tile_d).  `budget` bounds the double-buffered footprint of
    both operands per grid step (half the VMEM limit, leaving slack)."""
    sub_x, sub_t = _sublanes(isz_x), _sublanes(isz_t)
    sub = max(sub_x, sub_t)

    def per_lane(tn):            # bytes per lane: 2 pipeline buffers per operand
        return 2 * (_round_up(tn, sub_x) * isz_x + _round_up(tn, sub_t) * isz_t)

    # Batch-tile candidates: divisors of n that are multiples of the sublane
    # packing (no padding waste), capped at n//2 so the "parallel" batch axis
    # keeps >= 2 blocks (v7x megacore).  Fallback: full batch (megacore then
    # comes from the D-split grid axis instead).
    cands = [m for m in range(sub, n // 2 + 1, sub) if n % m == 0] or [n]

    # Grow tile_n while a full-D (lane-capped) block still fits the budget:
    # keeps small-D inputs bandwidth-bound instead of per-step-overhead-bound.
    d_lanes = min(_round_up(d, _LANE), _LANE_CAP)
    tile_n = cands[0]
    for m in cands:
        if per_lane(m) * d_lanes <= budget:
            tile_n = m

    # tile_d: full D if it fits; else the largest 128-multiple divisor of D
    # under the cap (mask-free); else the cap with a masked tail block.
    cap = (budget // per_lane(tile_n) // _LANE) * _LANE
    cap = max(_LANE, min(_LANE_CAP, cap))
    if d <= cap:
        return tile_n, d
    for k in range(cap // _LANE, 0, -1):
        if d % (k * _LANE) == 0:
            return tile_n, k * _LANE
    return tile_n, cap


def _dice_sums_kernel(x_ref, t_ref, out_ref, *, d_total, tile_d, db, tail_possible):
    p = pl.program_id(1)
    j = pl.program_id(2)

    @pl.when(j == 0)
    def _():
        out_ref[...] = jnp.zeros_like(out_ref)

    x = x_ref[...].astype(jnp.float32)
    t = t_ref[...].astype(jnp.float32)

    def accumulate(xv, tv):
        out_ref[:, 0:1] += jnp.sum(xv * tv, axis=1, keepdims=True)
        out_ref[:, 1:2] += jnp.sum(xv, axis=1, keepdims=True)
        out_ref[:, 2:3] += jnp.sum(tv, axis=1, keepdims=True)

    if tail_possible:
        blk = p * db + j                       # global D-block index (pre-clamp)
        is_full = (blk + 1) * tile_d <= d_total

        @pl.when(is_full)                      # steady state: no mask cost
        def _():
            accumulate(x, t)

        @pl.when(jnp.logical_not(is_full))     # ragged tail / clamped overflow block
        def _():
            col = blk * tile_d + jax.lax.broadcasted_iota(jnp.int32, x.shape, 1)
            valid = col < d_total
            # Mask BEFORE the multiply so OOB garbage never reaches the sums.
            accumulate(jnp.where(valid, x, 0.0), jnp.where(valid, t, 0.0))
    else:
        accumulate(x, t)


def dice_loss(inp, target, smooth=1.0):
    """Pallas implementation of DiceLoss.forward(input, target)."""
    n = inp.shape[0]
    x = inp.reshape(n, -1)          # native dtype; per-tile cast to f32 in-kernel
    t = target.reshape(n, -1)
    d = x.shape[1]

    vmem_limit = _vmem_limit_bytes()
    tile_n, tile_d = _choose_tiles(n, d, x.dtype.itemsize, t.dtype.itemsize,
                                   budget=vmem_limit // 2)

    nb = n // tile_n
    db_total = pl.cdiv(d, tile_d)
    # v7x megacore fallback: if the batch axis has only one block, split the D
    # range across two "parallel" grid blocks (one per TensorCore).
    p_split = 2 if (nb == 1 and db_total >= 2) else 1
    db = pl.cdiv(db_total, p_split)
    tail_possible = (p_split * db * tile_d) != d

    def in_map(i, p, j):
        # Clamp so the (rare) overflow block of the second D-split half stays
        # in-bounds; its contribution is masked to zero in the kernel.
        return (i, jnp.minimum(p * db + j, db_total - 1))

    kernel = functools.partial(_dice_sums_kernel, d_total=d, tile_d=tile_d,
                               db=db, tail_possible=tail_possible)

    cost = pl.CostEstimate(
        flops=4 * n * d,
        transcendentals=0,
        bytes_accessed=n * d * (x.dtype.itemsize + t.dtype.itemsize)
        + p_split * n * 3 * 4,
    )

    sums = pl.pallas_call(
        kernel,
        out_shape=jax.ShapeDtypeStruct((p_split, n, 3), jnp.float32),
        grid_spec=pltpu.PrefetchScalarGridSpec(
            num_scalar_prefetch=0,
            grid=(nb, p_split, db),
            in_specs=[
                pl.BlockSpec((tile_n, tile_d), in_map),
                pl.BlockSpec((tile_n, tile_d), in_map),
            ],
            out_specs=pl.BlockSpec((None, tile_n, 3), lambda i, p, j: (p, i, 0)),
        ),
        compiler_params=pltpu.CompilerParams(
            dimension_semantics=("parallel", "parallel", "arbitrary"),
            vmem_limit_bytes=vmem_limit,
        ),
        cost_estimate=cost,
    )(x, t)

    # Scalar epilogue in plain JAX (keeps both leading grid axes legally parallel).
    sums = jnp.sum(sums, axis=0)                 # (n, 3): fold the per-core halves
    inter, xs, ts = sums[:, 0], sums[:, 1], sums[:, 2]
    dice = (2.0 * inter + smooth) / (xs + ts + smooth)
    return 1.0 - jnp.sum(dice) / n


def dice_loss_ref(inp, target, smooth=1.0):
    n = inp.shape[0]
    x = inp.reshape(n, -1)
    t = target.reshape(n, -1)
    inter = jnp.sum(x * t, axis=1)
    dice = (2.0 * inter + smooth) / (jnp.sum(x, axis=1) + jnp.sum(t, axis=1) + smooth)
    return 1.0 - jnp.sum(dice) / n


if __name__ == "__main__":
    key = jax.random.PRNGKey(0)
    k1, k2 = jax.random.split(key)
    # NCHW shapes consistent with a segmentation loss: batch=2, ch=4, 16x16
    x = jax.random.uniform(k1, (2, 4, 16, 16), dtype=jnp.float32)            # predictions
    y = (jax.random.uniform(k2, (2, 4, 16, 16)) > 0.5).astype(jnp.float32)   # binary targets

    loss = dice_loss(x, y, smooth=1.0)
    loss = jax.block_until_ready(loss)

    ref = dice_loss_ref(x, y, smooth=1.0)
    assert jnp.allclose(loss, ref, rtol=1e-5, atol=1e-6), (loss, ref)

    print("KERNEL_OK")
</pallas_src>

<mosaic_0001>
module attributes {stable_mosaic.version = 11 : i64} {
  func.func @_dice_sums_kernel(%arg0: i32, %arg1: i32, %arg2: i32, %arg3: memref<2x1024xf32, #tpu.memory_space<vmem>>, %arg4: memref<2x1024xf32, #tpu.memory_space<vmem>>, %arg5: memref<1x2x3xf32, #tpu.memory_space<vmem>>) attributes {dimension_semantics = [#tpu.dimension_semantics<parallel>, #tpu.dimension_semantics<parallel>, #tpu.dimension_semantics<arbitrary>], iteration_bounds = array<i64: 1, 1, 1>, scalar_prefetch = 0 : i64, scratch_operands = 0 : i64, tpu.core_type = #tpu.core_type<tc>, window_params = [{transform_indices = @transform_0, window_bounds = array<i64: 2, 1024>}, {transform_indices = @transform_1, window_bounds = array<i64: 2, 1024>}, {transform_indices = @transform_2, window_bounds = array<i64: 1, 2, 3>}]} {
    %c0_i32 = arith.constant 0 : i32
    %0 = arith.cmpi eq, %arg2, %c0_i32 : i32
    %1 = arith.extui %0 : i1 to i32
    %c0_i32_0 = arith.constant 0 : i32
    %2 = arith.cmpi ne, %1, %c0_i32_0 : i32
    scf.if %2 {
      %cst_22 = arith.constant 0.000000e+00 : f32
      %30 = vector.broadcast %cst_22 : f32 to vector<2x3xf32>
      %c0_23 = arith.constant 0 : index
      %c0_24 = arith.constant 0 : index
      %c0_25 = arith.constant 0 : index
      %31 = vector.load %arg5[%c0_23, %c0_24, %c0_25] : memref<1x2x3xf32, #tpu.memory_space<vmem>>, vector<1x2x3xf32>
      %32 = vector.shape_cast %31 : vector<1x2x3xf32> to vector<2x3xf32>
      %33 = vector.shape_cast %30 : vector<2x3xf32> to vector<1x2x3xf32>
      tpu.vector_store %arg5[%c0_23, %c0_24, %c0_25], %33 {strides = array<i32>} : memref<1x2x3xf32, #tpu.memory_space<vmem>>, vector<1x2x3xf32>,
    } else {
    }
    %c0 = arith.constant 0 : index
    %c0_1 = arith.constant 0 : index
    %3 = vector.load %arg3[%c0, %c0_1] : memref<2x1024xf32, #tpu.memory_space<vmem>>, vector<2x1024xf32>
    %c0_2 = arith.constant 0 : index
    %c0_3 = arith.constant 0 : index
    %4 = vector.load %arg4[%c0_2, %c0_3] : memref<2x1024xf32, #tpu.memory_space<vmem>>, vector<2x1024xf32>
    %c0_4 = arith.constant 0 : index
    %c0_5 = arith.constant 0 : index
    %c0_6 = arith.constant 0 : index
    %5 = vector.load %arg5[%c0_4, %c0_5, %c0_6] : memref<1x2x3xf32, #tpu.memory_space<vmem>>, vector<1x2x1xf32>
    %6 = vector.shape_cast %5 : vector<1x2x1xf32> to vector<2x1xf32>
    %7 = arith.mulf %3, %4 : vector<2x1024xf32>
    %cst = arith.constant dense<0.000000e+00> : vector<2xf32>
    %8 = vector.multi_reduction <add>, %7, %cst [1] : vector<2x1024xf32> to vector<2xf32>
    %9 = vector.shape_cast %8 : vector<2xf32> to vector<2x1xf32>
    %10 = arith.addf %6, %9 : vector<2x1xf32>
    %c0_7 = arith.constant 0 : index
    %c0_8 = arith.constant 0 : index
    %c0_9 = arith.constant 0 : index
    %11 = vector.load %arg5[%c0_7, %c0_8, %c0_9] : memref<1x2x3xf32, #tpu.memory_space<vmem>>, vector<1x2x1xf32>
    %12 = vector.shape_cast %11 : vector<1x2x1xf32> to vector<2x1xf32>
    %13 = vector.shape_cast %10 : vector<2x1xf32> to vector<1x2x1xf32>
    tpu.vector_store %arg5[%c0_7, %c0_8, %c0_9], %13 {strides = array<i32>} : memref<1x2x3xf32, #tpu.memory_space<vmem>>, vector<1x2x1xf32>,
    %c0_10 = arith.constant 0 : index
    %c0_11 = arith.constant 0 : index
    %c1 = arith.constant 1 : index
    %14 = vector.load %arg5[%c0_10, %c0_11, %c1] : memref<1x2x3xf32, #tpu.memory_space<vmem>>, vector<1x2x1xf32>
    %15 = vector.shape_cast %14 : vector<1x2x1xf32> to vector<2x1xf32>
    %cst_12 = arith.constant dense<0.000000e+00> : vector<2xf32>
    %16 = vector.multi_reduction <add>, %3, %cst_12 [1] : vector<2x1024xf32> to vector<2xf32>
    %17 = vector.shape_cast %16 : vector<2xf32> to vector<2x1xf32>
    %18 = arith.addf %15, %17 : vector<2x1xf32>
    %c0_13 = arith.constant 0 : index
    %c0_14 = arith.constant 0 : index
    %c1_15 = arith.constant 1 : index
    %19 = vector.load %arg5[%c0_13, %c0_14, %c1_15] : memref<1x2x3xf32, #tpu.memory_space<vmem>>, vector<1x2x1xf32>
    %20 = vector.shape_cast %19 : vector<1x2x1xf32> to vector<2x1xf32>
    %21 = vector.shape_cast %18 : vector<2x1xf32> to vector<1x2x1xf32>
    tpu.vector_store %arg5[%c0_13, %c0_14, %c1_15], %21 {strides = array<i32>} : memref<1x2x3xf32, #tpu.memory_space<vmem>>, vector<1x2x1xf32>,
    %c0_16 = arith.constant 0 : index
    %c0_17 = arith.constant 0 : index
    %c2 = arith.constant 2 : index
    %22 = vector.load %arg5[%c0_16, %c0_17, %c2] : memref<1x2x3xf32, #tpu.memory_space<vmem>>, vector<1x2x1xf32>
    %23 = vector.shape_cast %22 : vector<1x2x1xf32> to vector<2x1xf32>
    %cst_18 = arith.constant dense<0.000000e+00> : vector<2xf32>
    %24 = vector.multi_reduction <add>, %4, %cst_18 [1] : vector<2x1024xf32> to vector<2xf32>
    %25 = vector.shape_cast %24 : vector<2xf32> to vector<2x1xf32>
    %26 = arith.addf %23, %25 : vector<2x1xf32>
    %c0_19 = arith.constant 0 : index
    %c0_20 = arith.constant 0 : index
    %c2_21 = arith.constant 2 : index
    %27 = vector.load %arg5[%c0_19, %c0_20, %c2_21] : memref<1x2x3xf32, #tpu.memory_space<vmem>>, vector<1x2x1xf32>
    %28 = vector.shape_cast %27 : vector<1x2x1xf32> to vector<2x1xf32>
    %29 = vector.shape_cast %26 : vector<2x1xf32> to vector<1x2x1xf32>
    tpu.vector_store %arg5[%c0_19, %c0_20, %c2_21], %29 {strides = array<i32>} : memref<1x2x3xf32, #tpu.memory_space<vmem>>, vector<1x2x1xf32>,
    return
  }
  func.func @transform_0(%arg0: i32, %arg1: i32, %arg2: i32) -> (i32, i32) {
    %c1_i32 = arith.constant 1 : i32
    %0 = arith.muli %arg1, %c1_i32 : i32
    %1 = arith.addi %0, %arg2 : i32
    %c0_i32 = arith.constant 0 : i32
    %2 = arith.minsi %1, %c0_i32 : i32
    %c0_i32_0 = arith.constant 0 : i32
    return %arg0, %2 : i32, i32
  }
  func.func @transform_1(%arg0: i32, %arg1: i32, %arg2: i32) -> (i32, i32) {
    %c1_i32 = arith.constant 1 : i32
    %0 = arith.muli %arg1, %c1_i32 : i32
    %1 = arith.addi %0, %arg2 : i32
    %c0_i32 = arith.constant 0 : i32
    %2 = arith.minsi %1, %c0_i32 : i32
    %c0_i32_0 = arith.constant 0 : i32
    return %arg0, %2 : i32, i32
  }
  func.func @transform_2(%arg0: i32, %arg1: i32, %arg2: i32) -> (i32, i32, i32) {
    %c0_i32 = arith.constant 0 : i32
    %c0_i32_0 = arith.constant 0 : i32
    return %arg1, %arg0, %c0_i32 : i32, i32, i32
  }
}

</mosaic_0001>

<bundles_post_ra>
// kernel: tpu_custom_call.1
= control target key start
LH: loop header
LB: loop body
LE: loop exit
PB: predicated region body
PF: predicated region fallthrough
CT: control target
= control target key end

     0   :  { %7 = vsyncpa [#allocation3], 0  ;;  %s355_s0 = inlined_call_operand.hbm [shape: f32[2,1024], index: 0, kind: input, shape index: {}]   ;;  %s356_s1 = inlined_call_operand.hbm [shape: f32[2,1024], index: 1, kind: input, shape index: {}]   ;;  %s357_s2 = inlined_call_operand.hbm [shape: f32[1,2,3], index: 2, kind: output, shape index: {}]  }
   0x1   :  { %8 = vsyncpa [#allocation6], 0 }
   0x2   :  { %9 = vsyncpa [#allocation4], 0  ;;  %s21_s11 = sshll.u32 %s355_s0, 4  ;;  %s303_s12 = smov [#allocation2]   ;;  %s22_s11 = int_to_ptr.hbm [resolvable:$true] %s21_s11 }
   0x3   :  { %s23_s13 = sshll.u32 %s303_s12, 4  ;;  %s38_s16 = sshll.u32 %s356_s1, 4  ;;  %s24_s13 = int_to_ptr.vmem [resolvable:$true] %s23_s13  ;;  %s39_s16 = int_to_ptr.hbm [resolvable:$true] %s38_s16 }
   0x4   :  { %26 = dma.hbm_to_vmem [thread:$0]  %s22_s11, 256, %s24_s13, [#allocation3]  }
   0x5   :  { %s304_s17 = smov [#allocation5]  }
   0x6   :  { %s40_s18 = sshll.u32 %s304_s17, 4  ;;  %s41_s18 = int_to_ptr.vmem [resolvable:$true] %s40_s18 }
   0x7   :  { %43 = dma.hbm_to_vmem [thread:$0]  %s39_s16, 256, %s41_s18, [#allocation6]  }
   0x8   :  { %297 = dma.done.wait [#allocation3], 256  }
   0x9   :  { %298 = vsyncadd [#allocation3], 4294967040 }
   0xa   :  { %299 = dma.done.wait [#allocation6], 256  }
   0xb   :  { %300 = vsyncadd [#allocation6], 4294967040  ;;  %v66_v0 = vld [vmem:[#allocation2] sm:$0xff]  ;;  %v67_v1 = vld [vmem:[#allocation2 + $0x8] sm:$0xff]  ;;  %vm94_vm0 = vcmask 1041408   ;;  %vm64_vm1 = vcmask 17408  }
   0xc   :  { %v68_v2 = vld [vmem:[#allocation5] sm:$0xff]  ;;  %v69_v3 = vld [vmem:[#allocation5 + $0x8] sm:$0xff]  ;;  %v305_v25 = vmov 0.0   ;;  %vm113_vm2 = vcmask 1024   ;;  %vm155_vm3 = vcmask 9224   ;;  %s306_s0 = smov [#allocation7]  }
   0xd   :  { %v71_v4 = vmul.f32 %v68_v2, %v66_v0  ;;  %v72_v5 = vmul.f32 %v69_v3, %v67_v1  ;;  %65 = vst.msk [vmem:[#allocation7] sm:$0x3] %vm64_vm1, %v305_v25  ;;  %s204_s1 = sshll.u32 %s306_s0, 4  ;;  %s206_s21 = sshll.u32 %s357_s2, 4  ;;  %vm197_vm4 = vcmask 17424   ;;  %s205_s1 = int_to_ptr.vmem [resolvable:$true] %s204_s1  ;;  %s207_s21 = int_to_ptr.hbm [resolvable:$true] %s206_s21 }
   0xf   :  { %75 = vst [vmem:[#allocation1] ss:$4 sm:$0xff] %v71_v4 }
  0x10   :  { %77 = vst [vmem:[#allocation1 + $0x20] ss:$4 sm:$0xff] %v72_v5 }
  0x16   :  { %v78_v6 = vld.sshfl [vmem:[#allocation1] sm:$0xff pattern:$0x73625140]  ;;  %v79_v7 = vld.sshfl [vmem:[#allocation1 + $0x8] sm:$0xff pattern:$0x73625140] }
  0x17   :  { %v80_v8 = vld.sshfl [vmem:[#allocation1 + $0x10] sm:$0xff pattern:$0x73625140]  ;;  %v81_v9 = vld.sshfl [vmem:[#allocation1 + $0x18] sm:$0xff pattern:$0x73625140] }
  0x18   :  { %v82_v10 = vld.sshfl [vmem:[#allocation1 + $0x20] sm:$0xff pattern:$0x73625140]  ;;  %v83_v11 = vld.sshfl [vmem:[#allocation1 + $0x28] sm:$0xff pattern:$0x73625140] }
  0x19   :  { %v84_v12 = vld.sshfl [vmem:[#allocation1 + $0x30] sm:$0xff pattern:$0x73625140]  ;;  %v85_v13 = vld.sshfl [vmem:[#allocation1 + $0x38] sm:$0xff pattern:$0x73625140] }
  0x1a   :  { %v95_v14 = vsel %vm94_vm0, %v78_v6, 0.0  ;;  %v96_v15 = vsel %vm94_vm0, %v79_v7, 0.0  ;;  %v98_v16 = vsel %vm94_vm0, %v80_v8, 0.0  ;;  %118 = vst [vmem:[#allocation1] ss:$4 sm:$0xff] %v66_v0  ;;  %v100_v18 = vsel %vm94_vm0, %v81_v9, 0.0 }
  0x1b   :  { %v97_v17 = vadd.f32 %v96_v15, %v95_v14  ;;  %120 = vst [vmem:[#allocation1 + $0x20] ss:$4 sm:$0xff] %v67_v1  ;;  %v102_v20 = vsel %vm94_vm0, %v82_v10, 0.0  ;;  %v104_v22 = vsel %vm94_vm0, %v83_v11, 0.0  ;;  %v106_v23 = vsel %vm94_vm0, %v84_v12, 0.0 }
  0x1c   :  { %v108_v24 = vsel %vm94_vm0, %v85_v13, 0.0  ;;  %v70_v12 = vld [vmem:[#allocation7] sm:$0x3] }
  0x1d   :  { %v99_v19 = vadd.f32 %v98_v16, %v97_v17 }
  0x1f   :  { %v101_v21 = vadd.f32 %v100_v18, %v99_v19 }
  0x21   :  { %v103_v26 = vadd.f32 %v102_v20, %v101_v21  ;;  %v121_v27 = vld.sshfl [vmem:[#allocation1] sm:$0xff pattern:$0x73625140]  ;;  %v122_v28 = vld.sshfl [vmem:[#allocation1 + $0x8] sm:$0xff pattern:$0x73625140] }
  0x22   :  { %v123_v29 = vld.sshfl [vmem:[#allocation1 + $0x10] sm:$0xff pattern:$0x73625140]  ;;  %v124_v30 = vld.sshfl [vmem:[#allocation1 + $0x18] sm:$0xff pattern:$0x73625140] }
  0x23   :  { %v105_v31 = vadd.f32 %v104_v22, %v103_v26  ;;  %v125_v32 = vld.sshfl [vmem:[#allocation1 + $0x20] sm:$0xff pattern:$0x73625140]  ;;  %v126_v33 = vld.sshfl [vmem:[#allocation1 + $0x28] sm:$0xff pattern:$0x73625140] }
  0x24   :  { %v127_v34 = vld.sshfl [vmem:[#allocation1 + $0x30] sm:$0xff pattern:$0x73625140]  ;;  %v128_v35 = vld.sshfl [vmem:[#allocation1 + $0x38] sm:$0xff pattern:$0x73625140] }
  0x25   :  { %v107_v36 = vadd.f32 %v106_v23, %v105_v31  ;;  %v137_v37 = vsel %vm94_vm0, %v121_v27, 0.0  ;;  %v138_v38 = vsel %vm94_vm0, %v122_v28, 0.0  ;;  %v140_v39 = vsel %vm94_vm0, %v123_v29, 0.0  ;;  %160 = vst [vmem:[#allocation1] ss:$4 sm:$0xff] %v68_v2 }
  0x26   :  { %v139_v40 = vadd.f32 %v138_v38, %v137_v37  ;;  %162 = vst [vmem:[#allocation1 + $0x20] ss:$4 sm:$0xff] %v69_v3  ;;  %v142_v42 = vsel %vm94_vm0, %v124_v30, 0.0  ;;  %v144_v44 = vsel %vm94_vm0, %v125_v32, 0.0  ;;  %v146_v46 = vsel %vm94_vm0, %v126_v33, 0.0 }
  0x27   :  { %v109_v41 = vadd.f32 %v108_v24, %v107_v36  ;;  %v148_v48 = vsel %vm94_vm0, %v127_v34, 0.0  ;;  %v150_v53 = vsel %vm94_vm0, %v128_v35, 0.0 }
  0x28   :  { %v141_v43 = vadd.f32 %v140_v39, %v139_v40 }
  0x29   :  { %110 = vadd.xlane.f32.xlu0 %v109_v41 }
  0x2a   :  { %v143_v45 = vadd.f32 %v142_v42, %v141_v43 }
  0x2c   :  { %v145_v47 = vadd.f32 %v144_v44, %v143_v45  ;;  %v163_v49 = vld.sshfl [vmem:[#allocation1] sm:$0xff pattern:$0x73625140]  ;;  %v164_v50 = vld.sshfl [vmem:[#allocation1 + $0x8] sm:$0xff pattern:$0x73625140] }
  0x2d   :  { %v165_v51 = vld.sshfl [vmem:[#allocation1 + $0x10] sm:$0xff pattern:$0x73625140]  ;;  %v166_v54 = vld.sshfl [vmem:[#allocation1 + $0x18] sm:$0xff pattern:$0x73625140] }
  0x2e   :  { %v147_v52 = vadd.f32 %v146_v46, %v145_v47  ;;  %v179_v56 = vsel %vm94_vm0, %v163_v49, 0.0  ;;  %v180_v57 = vsel %vm94_vm0, %v164_v50, 0.0  ;;  %v182_v58 = vsel %vm94_vm0, %v165_v51, 0.0  ;;  %v167_v59 = vld.sshfl [vmem:[#allocation1 + $0x20] sm:$0xff pattern:$0x73625140] }
  0x2f   :  { %v181_v60 = vadd.f32 %v180_v57, %v179_v56  ;;  %v184_v62 = vsel %vm94_vm0, %v166_v54, 0.0  ;;  %v168_v63 = vld.sshfl [vmem:[#allocation1 + $0x28] sm:$0xff pattern:$0x73625140]  ;;  %v186_v1 = vsel %vm94_vm0, %v167_v59, 0.0 }
  0x30   :  { %v149_v55 = vadd.f32 %v148_v48, %v147_v52  ;;  %v169_v2 = vld.sshfl [vmem:[#allocation1 + $0x30] sm:$0xff pattern:$0x73625140]  ;;  %v188_v4 = vsel %vm94_vm0, %v168_v63, 0.0 }
  0x31   :  { %v183_v0 = vadd.f32 %v182_v58, %v181_v60  ;;  %v170_v5 = vld.sshfl [vmem:[#allocation1 + $0x38] sm:$0xff pattern:$0x73625140]  ;;  %v190_v7 = vsel %vm94_vm0, %v169_v2, 0.0 }
  0x32   :  { %v151_v61 = vadd.f32 %v150_v53, %v149_v55  ;;  %v192_v9 = vsel %vm94_vm0, %v170_v5, 0.0 }
  0x33   :  { %v185_v3 = vadd.f32 %v184_v62, %v183_v0 }
  0x34   :  { %152 = vadd.xlane.f32.xlu0 %v151_v61 }
  0x35   :  { %v187_v6 = vadd.f32 %v186_v1, %v185_v3 }
  0x37   :  { %v189_v8 = vadd.f32 %v188_v4, %v187_v6 }
  0x39   :  { %v191_v10 = vadd.f32 %v190_v7, %v189_v8 }
  0x3b   :  { %v193_v11 = vadd.f32 %v192_v9, %v191_v10 }
  0x3d   :  { %194 = vadd.xlane.f32.xlu1 %v193_v11 }
  0x9c   :  { %v111_v13 = vpop.xlane.xlu0 %110 }
  0x9d   :  { %v112_v14 = vadd.f32 %v111_v13, %v70_v12 }
  0x9f   :  { %114 = vst.msk [vmem:[#allocation7] sm:$0x3] %vm113_vm2, %v112_v14 }
  0xa6   :  { %v115_v15 = vld [vmem:[#allocation7] sm:$0x3] }
  0xa7   :  { %v153_v16 = vpop.xlane.xlu0 %152 }
  0xa8   :  { %v154_v17 = vadd.f32 %v153_v16, %v115_v15 }
  0xaa   :  { %156 = vst.msk [vmem:[#allocation7] sm:$0x3] %vm155_vm3, %v154_v17 }
  0xb0   :  { %v195_v19 = vpop.xlane.xlu1 %194 }
  0xb1   :  { %v157_v18 = vld [vmem:[#allocation7] sm:$0x3] }
  0xb2   :  { %v196_v20 = vadd.f32 %v195_v19, %v157_v18 }
  0xb4   :  { %198 = vst.msk [vmem:[#allocation7] sm:$0x3] %vm197_vm4, %v196_v20 }
  0xb5   :  { %209 = dma.vmem_to_hbm [thread:$0]  %s205_s1, 32, %s207_s21, [#allocation4]  }
  0xb6   :  { %301 = dma.done.wait [#allocation4], 32  }
  0xb7   :  { %302 = vsyncadd [#allocation4], 4294967264 }
  0xb8   :  { %214 = vsyncpa [#allocation3], 1 }
  0xb9   :  { %215 = vsyncpa [#allocation6], 1 }
  0xba   :  { %216 = vsyncpa [#allocation4], 1 }

</bundles_post_ra>
